<compile_context>
chip_gen: v5e
topology: v5e:2x2
jax: 0.10.0
libtpu: 0.0.40
codegen_flags: <defaults>
</compile_context>

<pallas_src>
import jax
import jax.numpy as jnp
from jax.experimental import pallas as pl
from jax.experimental.pallas import tpu as pltpu


def _round_up(x, m):
    return ((x + m - 1) // m) * m


# -----------------------------------------------------------------------------
# Kernel body: one lane-dense MXU matmul + bias + ReLU per (token, N) tile.
# -----------------------------------------------------------------------------
def gcn_kernel(x_ref, a_ref, b_ref, o_ref):
    # x_ref : (tm, V*Din)   bf16, streamed per token tile
    # a_ref : (V*Din, tn)   bf16, folded m_norm (x) W column tile (VMEM-resident if tn == V*Dout)
    # b_ref : (1, tn)       f32, bias tiled over vertices
    # o_ref : (tm, tn)      bf16 (default) or f32
    y = jnp.dot(x_ref[...], a_ref[...], preferred_element_type=jnp.float32)
    y = y + b_ref[...]
    o_ref[...] = jnp.maximum(y, 0.0).astype(o_ref.dtype)


def _normalize(m):
    # D^{-1/2} M D^{-1/2} with D = diag(column sums), as in the PyTorch module.
    # Zero-degree columns are zeroed instead of producing inf.
    rowsum = jnp.sum(m, axis=0)
    safe = jnp.where(rowsum > 0, rowsum, 1.0)
    r_inv = jnp.where(rowsum > 0, jax.lax.rsqrt(safe), 0.0)
    return m * r_inv[:, None] * r_inv[None, :]


def prepare_gcn_params(adj, weight, bias, *, alpha=1.0, param_dtype=jnp.bfloat16):
    """Host-side fold: O(V^2*Din*Dout).  Compute ONCE per (adj, weight, bias) and
    reuse across forward calls; only gcn_apply() runs per call."""
    v = adj.shape[0]
    din, dout = weight.shape
    adjf = adj.astype(jnp.float32)
    if alpha == 1.0:                       # module default: skip the unused sqr_norm
        m_norm = _normalize(adjf)
    elif alpha == 0.0:
        m_norm = _normalize(adjf @ adjf)
    else:
        m_norm = alpha * _normalize(adjf) + (1.0 - alpha) * _normalize(adjf @ adjf)

    # Fold the two einsums into one (V*Din, V*Dout) matrix:
    #   out[t,(j,e)] = sum_{i,d} x[t,(i,d)] * m_norm[i,j] * W[d,e]
    a_fold = jnp.einsum("ij,de->idje", m_norm, weight.astype(jnp.float32),
                        precision=jax.lax.Precision.HIGHEST)
    a_fold = a_fold.reshape(v * din, v * dout).astype(param_dtype)
    b_fold = jnp.tile(bias.astype(jnp.float32), v).reshape(1, v * dout)
    return a_fold, b_fold


def gcn_apply(x, a_fold, b_fold, *, out_dtype=jnp.bfloat16, tm=None, tn=None):
    """Per-call fused kernel: relu(x @ a_fold + b_fold) on a (tokens, V*Din) layout."""
    a, b, v, din = x.shape
    k = v * din
    n = a_fold.shape[1]
    dout = n // v
    assert a_fold.shape[0] == k and b_fold.shape == (1, n)
    nt = a * b

    # --- tile selection -------------------------------------------------------
    # Token tile: fill the MXU (256 rows on v6e/v7x, >=128 on v5e); tiny token
    # counts collapse to a single grid step.  bf16 needs sublane tiles >= 16.
    if tm is None:
        tm = 256 if nt >= 256 else max(16, _round_up(nt, 16))
    nt_pad = _round_up(nt, tm)
    # N tile: keep the folded weight VMEM-resident when small; stream 128-aligned
    # column tiles through a second grid dimension when it grows.
    if tn is None:
        tn = n
        while tn > 2048 and tn % 256 == 0:
            tn //= 2
    assert n % tn == 0 and (tn % 128 == 0 or tn == n)
    n_tiles = n // tn
    resident = n_tiles == 1

    # (a, b, V, Din) -> (tokens, V*Din): pure reshape, no transpose; bf16 halves DMA.
    x2 = x.reshape(nt, k).astype(jnp.bfloat16)
    if nt_pad != nt:
        x2 = jnp.pad(x2, ((0, nt_pad - nt), (0, 0)))

    # --- specs ------------------------------------------------------------------
    x_spec = pl.BlockSpec((tm, k), lambda i, j: (i, 0))        # streamed per token tile
    out_spec = pl.BlockSpec((tm, tn), lambda i, j: (i, j))     # lane-dense stores (tn % 128 == 0)
    if resident:
        # Constant-index blocks: single-buffer to halve the resident VMEM footprint.
        a_spec = pl.BlockSpec((k, tn), lambda i, j: (0, j), pipeline_mode=pl.Buffered(1))
        b_spec = pl.BlockSpec((1, tn), lambda i, j: (0, j), pipeline_mode=pl.Buffered(1))
    else:
        a_spec = pl.BlockSpec((k, tn), lambda i, j: (0, j))
        b_spec = pl.BlockSpec((1, tn), lambda i, j: (0, j))

    out_itemsize = jnp.dtype(out_dtype).itemsize
    a_bufs = 1 if resident else 2
    vmem_need = (a_bufs * k * tn * 2 + a_bufs * 8 * tn * 4
                 + 2 * tm * k * 2 + 2 * tm * tn * out_itemsize + (2 << 20))
    vmem_limit = int(min(max(vmem_need, 16 << 20), 64 << 20))

    cost = pl.CostEstimate(
        flops=int(2 * nt_pad * k * n),
        transcendentals=0,
        bytes_accessed=int(nt_pad * k * 2
                           + (1 if resident else nt_pad // tm) * k * n * 2
                           + n * 4 + nt_pad * n * out_itemsize))

    out = pl.pallas_call(
        gcn_kernel,
        out_shape=jax.ShapeDtypeStruct((nt_pad, n), out_dtype),
        grid_spec=pltpu.PrefetchScalarGridSpec(
            num_scalar_prefetch=0,
            grid=(nt_pad // tm, n_tiles),
            in_specs=[x_spec, a_spec, b_spec],
            out_specs=out_spec,
        ),
        compiler_params=pltpu.CompilerParams(
            dimension_semantics=("parallel", "parallel"),
            vmem_limit_bytes=vmem_limit),
        cost_estimate=cost,
    )(x2, a_fold, b_fold)

    return out[:nt].reshape(a, b, v, dout)


def graph_convolution_pallas(adj, x, weight, bias, *, alpha=1.0, **kwargs):
    """One-shot convenience wrapper.  For repeated forwards with the same
    (adj, weight, bias), call prepare_gcn_params() once and reuse gcn_apply()."""
    a_fold, b_fold = prepare_gcn_params(adj, weight, bias, alpha=alpha)
    return gcn_apply(x, a_fold, b_fold, **kwargs)


def reference_forward(adj, x, weight, bias, alpha=1.0):
    """Pure-JAX transcription of GraphConvolution.forward (eval-mode dropout, f32)."""
    adjf = adj.astype(jnp.float32)
    m_norm = alpha * _normalize(adjf) + (1.0 - alpha) * _normalize(adjf @ adjf)
    x_tmp = jnp.einsum("abcd,de->abce", x, weight,
                       precision=jax.lax.Precision.HIGHEST)
    x_out = jnp.einsum("ij,abid->abjd", m_norm, x_tmp,
                       precision=jax.lax.Precision.HIGHEST)
    x_out = x_out + bias
    return jnp.maximum(x_out, 0.0)


if __name__ == "__main__":
    key = jax.random.PRNGKey(0)
    ks = jax.random.split(key, 4)

    # x is (a, b, num_vertex, input_dim); output_dim = 32
    A, B, Vn, DIN, DOUT = 2, 8, 16, 16, 32   # tokens=16, K=V*DIN=256, N=V*DOUT=512

    x = jax.random.normal(ks[0], (A, B, Vn, DIN), jnp.float32)
    # adjacency with strictly positive column sums (matches the module's use case)
    adj = jax.random.uniform(ks[1], (Vn, Vn), jnp.float32, minval=0.1, maxval=1.0)
    adj = 0.5 * (adj + adj.T) + jnp.eye(Vn, dtype=jnp.float32)
    # xavier-normal weight, randn bias (matches the module's init)
    weight = jax.random.normal(ks[2], (DIN, DOUT), jnp.float32) * jnp.sqrt(2.0 / (DIN + DOUT))
    bias = jax.random.normal(ks[3], (DOUT,), jnp.float32)

    # Fold once (cacheable across forward calls), then run the fused kernel.
    a_fold, b_fold = prepare_gcn_params(adj, weight, bias, alpha=1.0)
    out = gcn_apply(x, a_fold, b_fold)
    jax.block_until_ready(out)
    assert out.shape == (A, B, Vn, DOUT)

    ref = reference_forward(adj, x, weight, bias)
    out_f32 = out.astype(jnp.float32)
    err = float(jnp.max(jnp.abs(out_f32 - ref)))
    # bf16 operands + bf16 output vs. f32 reference (the PyTorch module runs fp16).
    if not bool(jnp.allclose(out_f32, ref, atol=6e-2, rtol=6e-2)):
        raise AssertionError(f"kernel/reference mismatch, max abs err = {err}")

    print("KERNEL_OK")
</pallas_src>

<mosaic_0001>
module attributes {stable_mosaic.version = 11 : i64} {
  func.func @gcn_kernel(%arg0: i32, %arg1: i32, %arg2: memref<16x256xbf16, #tpu.memory_space<vmem>>, %arg3: memref<256x512xbf16, #tpu.memory_space<vmem>>, %arg4: memref<1x512xf32, #tpu.memory_space<vmem>>, %arg5: memref<16x512xbf16, #tpu.memory_space<vmem>>) attributes {dimension_semantics = [#tpu.dimension_semantics<parallel>, #tpu.dimension_semantics<parallel>], iteration_bounds = array<i64: 1, 1>, scalar_prefetch = 0 : i64, scratch_operands = 0 : i64, tpu.core_type = #tpu.core_type<tc>, window_params = [{transform_indices = @transform_0, window_bounds = array<i64: 16, 256>}, {pipeline_mode = #tpu.pipeline_mode<synchronous>, transform_indices = @transform_1, window_bounds = array<i64: 256, 512>}, {pipeline_mode = #tpu.pipeline_mode<synchronous>, transform_indices = @transform_2, window_bounds = array<i64: 1, 512>}, {transform_indices = @transform_3, window_bounds = array<i64: 16, 512>}]} {
    %c0 = arith.constant 0 : index
    %c0_0 = arith.constant 0 : index
    %0 = vector.load %arg2[%c0, %c0_0] : memref<16x256xbf16, #tpu.memory_space<vmem>>, vector<16x256xbf16>
    %c0_1 = arith.constant 0 : index
    %c0_2 = arith.constant 0 : index
    %1 = vector.load %arg3[%c0_1, %c0_2] : memref<256x512xbf16, #tpu.memory_space<vmem>>, vector<256x512xbf16>
    %cst = arith.constant dense<0.000000e+00> : vector<16x512xf32>
    %2 = tpu.matmul %0, %1, %cst {dimension_numbers = #tpu.dot_dimension_numbers<[1], [0], [0], [1], [0, 0, 1, 1], [], []>} : vector<16x256xbf16>, vector<256x512xbf16>, vector<16x512xf32> -> vector<16x512xf32>
    %c0_3 = arith.constant 0 : index
    %c0_4 = arith.constant 0 : index
    %3 = vector.load %arg4[%c0_3, %c0_4] : memref<1x512xf32, #tpu.memory_space<vmem>>, vector<1x512xf32>
    %4 = vector.broadcast %3 : vector<1x512xf32> to vector<16x512xf32>
    %5 = arith.addf %2, %4 : vector<16x512xf32>
    %cst_5 = arith.constant 0.000000e+00 : f32
    %6 = vector.broadcast %cst_5 : f32 to vector<16x512xf32>
    %7 = arith.maximumf %5, %6 : vector<16x512xf32>
    %8 = arith.truncf %7 : vector<16x512xf32> to vector<16x512xbf16>
    %c0_6 = arith.constant 0 : index
    %c0_7 = arith.constant 0 : index
    %9 = vector.load %arg5[%c0_6, %c0_7] : memref<16x512xbf16, #tpu.memory_space<vmem>>, vector<16x512xbf16>
    tpu.vector_store %arg5[%c0_6, %c0_7], %8 {strides = array<i32>} : memref<16x512xbf16, #tpu.memory_space<vmem>>, vector<16x512xbf16>,
    return
  }
  func.func @transform_0(%arg0: i32, %arg1: i32) -> (i32, i32) {
    %c0_i32 = arith.constant 0 : i32
    %c0_i32_0 = arith.constant 0 : i32
    return %arg0, %c0_i32 : i32, i32
  }
  func.func @transform_1(%arg0: i32, %arg1: i32) -> (i32, i32) {
    %c0_i32 = arith.constant 0 : i32
    %c0_i32_0 = arith.constant 0 : i32
    return %c0_i32, %arg1 : i32, i32
  }
  func.func @transform_2(%arg0: i32, %arg1: i32) -> (i32, i32) {
    %c0_i32 = arith.constant 0 : i32
    %c0_i32_0 = arith.constant 0 : i32
    return %c0_i32, %arg1 : i32, i32
  }
  func.func @transform_3(%arg0: i32, %arg1: i32) -> (i32, i32) {
    %c0_i32 = arith.constant 0 : i32
    return %arg0, %arg1 : i32, i32
  }
}

</mosaic_0001>

<bundles_post_ra>
// kernel: tpu_custom_call.1
= control target key start
LH: loop header
LB: loop body
LE: loop exit
PB: predicated region body
PF: predicated region fallthrough
CT: control target
= control target key end

     0   :  { %8 = vsyncpa [#allocation3], 0  ;;  %s1112_s0 = inlined_call_operand.hbm [shape: bf16[16,256], index: 0, kind: input, shape index: {}]   ;;  %s1113_s1 = inlined_call_operand.hbm [shape: bf16[256,512], index: 1, kind: input, shape index: {}]   ;;  %s1114_s2 = inlined_call_operand.hbm [shape: f32[1,512], index: 2, kind: input, shape index: {}]   ;;  %s1115_s3 = inlined_call_operand.hbm [shape: bf16[16,512], index: 3, kind: output, shape index: {}]  }
   0x1   :  { %9 = vsyncpa [#allocation6], 0  ;;  %s28_s14 = sshll.u32 %s1113_s1, 4  ;;  %s29_s14 = int_to_ptr.hbm [resolvable:$true] %s28_s14 }
   0x2   :  { %10 = vsyncpa [#allocation4], 0  ;;  %s1054_s15 = smov [#allocation5]   ;;  %s15_s19 = sshll.u32 %s1112_s0, 4  ;;  %s16_s19 = int_to_ptr.hbm [resolvable:$true] %s15_s19 }
   0x3   :  { %s30_s16 = sshll.u32 %s1054_s15, 4  ;;  %s1055_s20 = smov 256   ;;  %s31_s16 = int_to_ptr.vmem [resolvable:$true] %s30_s16 }
   0x4   :  { %s1056_s21 = smov 16   ;;  %s1057_s22 = smov [#allocation2]  }
   0x5   :  { %36 = dma.hbm_to_vmem [thread:$0]  %s29_s14, 8192, %s31_s16, [#allocation6], %s1055_s20, %s1055_s20, %s1056_s21  }
   0x6   :  { %s17_s23 = sshll.u32 %s1057_s22, 4  ;;  %s1058_s1 = smov 128   ;;  %s18_s23 = int_to_ptr.vmem [resolvable:$true] %s17_s23 }
   0x7   :  { %s1059_s24 = smov 8   ;;  %s42_s27 = sshll.u32 %s1114_s2, 4  ;;  %s43_s27 = int_to_ptr.hbm [resolvable:$true] %s42_s27 }
   0x8   :  { %23 = dma.hbm_to_vmem [thread:$0]  %s16_s19, 256, %s18_s23, [#allocation3], %s1058_s1, %s1058_s1, %s1059_s24  }
   0x9   :  { %s1060_s28 = smov [#allocation7]  }
   0xa   :  { %s44_s0 = sshll.u32 %s1060_s28, 4  ;;  %s45_s0 = int_to_ptr.vmem [resolvable:$true] %s44_s0 }
   0xb   :  { %47 = dma.hbm_to_vmem [thread:$0]  %s43_s27, 64, %s45_s0, [#allocation6]  }
   0xc   :  { %1048 = dma.done.wait [#allocation3], 256  }
   0xd   :  { %1049 = vsyncadd [#allocation3], 4294967040 }
   0xe   :  { %1050 = dma.done.wait [#allocation6], 8256  }
   0xf   :  { %1051 = vsyncadd [#allocation6], 4294959040  ;;  %v736_v0 = vld [vmem:[#allocation5 + $0xe0] sm:$0xf]  ;;  %v910_v1 = vld [vmem:[#allocation5 + $0xec] sm:$0xf0] }
  0x10   :  { %v864_v2 = vld [vmem:[#allocation5 + $0x1e0] sm:$0xf]  ;;  %v737_v3 = vor.u32 %v910_v1, %v736_v0  ;;  %v942_v4 = vld [vmem:[#allocation5 + $0x1ec] sm:$0xf0]  ;;  %v908_v5 = vld [vmem:[#allocation5 + $0xe4] sm:$0xf] }
  0x11   :  { %v738_v6 = vld [vmem:[#allocation5 + $0xf0] sm:$0xf0]  ;;  %v865_v7 = vor.u32 %v942_v4, %v864_v2  ;;  %v940_v9 = vld [vmem:[#allocation5 + $0x1e4] sm:$0xf]  ;;  %v720_v11 = vld [vmem:[#allocation5 + $0xc0] sm:$0xf] }
  0x12   :  { %v741_v8 = vor.u32 %v908_v5, %v738_v6  ;;  %v866_v10 = vld [vmem:[#allocation5 + $0x1f0] sm:$0xf0]  ;;  %466 = vmatpush.bf16.msra.mxu0 %v737_v3  ;;  %v906_v13 = vld [vmem:[#allocation5 + $0xcc] sm:$0xf0]  ;;  %v848_v14 = vld [vmem:[#allocation5 + $0x1c0] sm:$0xf] }
  0x13   :  { %v869_v12 = vor.u32 %v940_v9, %v866_v10  ;;  %v938_v15 = vld [vmem:[#allocation5 + $0x1cc] sm:$0xf0]  ;;  %480 = vmatpush.bf16.msra.mxu1 %v865_v7  ;;  %v721_v16 = vor.u32 %v906_v13, %v720_v11  ;;  %v904_v18 = vld [vmem:[#allocation5 + $0xc4] sm:$0xf]  ;;  %v722_v19 = vld [vmem:[#allocation5 + $0xd0] sm:$0xf0] }
  0x14   :  { %494 = vmatpush.bf16.msra.mxu2 %v741_v8  ;;  %v849_v17 = vor.u32 %v938_v15, %v848_v14  ;;  %v936_v20 = vld [vmem:[#allocation5 + $0x1c4] sm:$0xf]  ;;  %v725_v21 = vor.u32 %v904_v18, %v722_v19  ;;  %v850_v22 = vld [vmem:[#allocation5 + $0x1d0] sm:$0xf0]  ;;  %v704_v23 = vld [vmem:[#allocation5 + $0xa0] sm:$0xf] }
  0x15   :  { %508 = vmatpush.bf16.msra.mxu3 %v869_v12  ;;  %v902_v24 = vld [vmem:[#allocation5 + $0xac] sm:$0xf0]  ;;  %v853_v25 = vor.u32 %v936_v20, %v850_v22  ;;  %v832_v26 = vld [vmem:[#allocation5 + $0x1a0] sm:$0xf]  ;;  %v900_v28 = vld [vmem:[#allocation5 + $0xa4] sm:$0xf] }
  0x16   :  { %v934_v27 = vld [vmem:[#allocation5 + $0x1ac] sm:$0xf0]  ;;  %467 = vmatpush.bf16.msra.mxu0 %v721_v16  ;;  %v705_v29 = vor.u32 %v902_v24, %v704_v23  ;;  %v706_v30 = vld [vmem:[#allocation5 + $0xb0] sm:$0xf0]  ;;  %v932_v31 = vld [vmem:[#allocation5 + $0x1a4] sm:$0xf] }
  0x17   :  { %v834_v32 = vld [vmem:[#allocation5 + $0x1b0] sm:$0xf0]  ;;  %481 = vmatpush.bf16.msra.mxu1 %v849_v17  ;;  %v833_v33 = vor.u32 %v934_v27, %v832_v26  ;;  %v709_v34 = vor.u32 %v900_v28, %v706_v30  ;;  %v688_v35 = vld [vmem:[#allocation5 + $0x80] sm:$0xf]  ;;  %v898_v36 = vld [vmem:[#allocation5 + $0x8c] sm:$0xf0] }
  0x18   :  { %495 = vmatpush.bf16.msra.mxu2 %v725_v21  ;;  %v816_v37 = vld [vmem:[#allocation5 + $0x180] sm:$0xf]  ;;  %v837_v38 = vor.u32 %v932_v31, %v834_v32  ;;  %v930_v39 = vld [vmem:[#allocation5 + $0x18c] sm:$0xf0]  ;;  %v896_v40 = vld [vmem:[#allocation5 + $0x84] sm:$0xf]  ;;  %v689_v44 = vor.u32 %v898_v36, %v688_v35 }
  0x19   :  { %509 = vmatpush.bf16.msra.mxu3 %v853_v25  ;;  %v690_v41 = vld [vmem:[#allocation5 + $0x90] sm:$0xf0]  ;;  %v928_v42 = vld [vmem:[#allocation5 + $0x184] sm:$0xf]  ;;  %v817_v45 = vor.u32 %v930_v39, %v816_v37  ;;  %v672_v47 = vld [vmem:[#allocation5 + $0x60] sm:$0xf] }
  0x1a   :  { %v818_v43 = vld [vmem:[#allocation5 + $0x190] sm:$0xf0]  ;;  %468 = vmatpush.bf16.msra.mxu0 %v705_v29  ;;  %v693_v46 = vor.u32 %v896_v40, %v690_v41  ;;  %v894_v48 = vld [vmem:[#allocation5 + $0x6c] sm:$0xf0]  ;;  %v800_v49 = vld [vmem:[#allocation5 + $0x160] sm:$0xf] }
  0x1b   :  { %482 = vmatpush.bf16.msra.mxu1 %v833_v33  ;;  %v821_v50 = vor.u32 %v928_v42, %v818_v43  ;;  %v926_v51 = vld [vmem:[#allocation5 + $0x16c] sm:$0xf0]  ;;  %v892_v52 = vld [vmem:[#allocation5 + $0x64] sm:$0xf]  ;;  %v674_v53 = vld [vmem:[#allocation5 + $0x70] sm:$0xf0]  ;;  %v673_v56 = vor.u32 %v894_v48, %v672_v47 }
  0x1c   :  { %496 = vmatpush.bf16.msra.mxu2 %v709_v34  ;;  %v924_v54 = vld [vmem:[#allocation5 + $0x164] sm:$0xf]  ;;  %v802_v55 = vld [vmem:[#allocation5 + $0x170] sm:$0xf0]  ;;  %v801_v57 = vor.u32 %v926_v51, %v800_v49  ;;  %v677_v58 = vor.u32 %v892_v52, %v674_v53  ;;  %v656_v59 = vld [vmem:[#allocation5 + $0x40] sm:$0xf] }
  0x1d   :  { %510 = vmatpush.bf16.msra.mxu3 %v837_v38  ;;  %v890_v60 = vld [vmem:[#allocation5 + $0x4c] sm:$0xf0]  ;;  %v784_v61 = vld [vmem:[#allocation5 + $0x140] sm:$0xf]  ;;  %v805_v62 = vor.u32 %v924_v54, %v802_v55  ;;  %v888_v0 = vld [vmem:[#allocation5 + $0x44] sm:$0xf] }
  0x1e   :  { %469 = vmatpush.bf16.msra.mxu0 %v689_v44  ;;  %v922_v63 = vld [vmem:[#allocation5 + $0x14c] sm:$0xf0]  ;;  %v658_v1 = vld [vmem:[#allocation5 + $0x50] sm:$0xf0]  ;;  %v920_v2 = vld [vmem:[#allocation5 + $0x144] sm:$0xf]  ;;  %v657_v4 = vor.u32 %v890_v60, %v656_v59 }
  0x1f   :  { %483 = vmatpush.bf16.msra.mxu1 %v817_v45  ;;  %v786_v3 = vld [vmem:[#allocation5 + $0x150] sm:$0xf0]  ;;  %v785_v5 = vor.u32 %v922_v63, %v784_v61  ;;  %v661_v6 = vor.u32 %v888_v0, %v658_v1  ;;  %v640_v7 = vld [vmem:[#allocation5 + $0x20] sm:$0xf]  ;;  %v886_v8 = vld [vmem:[#allocation5 + $0x2c] sm:$0xf0] }
  0x20   :  { %497 = vmatpush.bf16.msra.mxu2 %v693_v46  ;;  %v768_v9 = vld [vmem:[#allocation5 + $0x120] sm:$0xf]  ;;  %v789_v10 = vor.u32 %v920_v2, %v786_v3  ;;  %v918_v11 = vld [vmem:[#allocation5 + $0x12c] sm:$0xf0]  ;;  %v884_v12 = vld [vmem:[#allocation5 + $0x24] sm:$0xf]  ;;  %v641_v16 = vor.u32 %v886_v8, %v640_v7 }
  0x21   :  { %511 = vmatpush.bf16.msra.mxu3 %v821_v50  ;;  %v642_v13 = vld [vmem:[#allocation5 + $0x30] sm:$0xf0]  ;;  %v916_v14 = vld [vmem:[#allocation5 + $0x124] sm:$0xf]  ;;  %v624_v17 = vld [vmem:[#allocation5] sm:$0xf]  ;;  %v769_v20 = vor.u32 %v918_v11, %v768_v9 }
  0x22   :  { %470 = vmatpush.bf16.msra.mxu0 %v673_v56  ;;  %v770_v15 = vld [vmem:[#allocation5 + $0x130] sm:$0xf0]  ;;  %v882_v18 = vld [vmem:[#allocation5 + $0xc] sm:$0xf0]  ;;  %v752_v19 = vld [vmem:[#allocation5 + $0x100] sm:$0xf]  ;;  %v645_v21 = vor.u32 %v884_v12, %v642_v13 }
  0x23   :  { %484 = vmatpush.bf16.msra.mxu1 %v801_v57  ;;  %v914_v22 = vld [vmem:[#allocation5 + $0x10c] sm:$0xf0]  ;;  %v880_v23 = vld [vmem:[#allocation5 + $0x4] sm:$0xf]  ;;  %v626_v24 = vld [vmem:[#allocation5 + $0x10] sm:$0xf0]  ;;  %v773_v25 = vor.u32 %v916_v14, %v770_v15  ;;  %v625_v32 = vor.u32 %v882_v18, %v624_v17 }
  0x24   :  { %498 = vmatpush.bf16.msra.mxu2 %v677_v58  ;;  %v912_v26 = vld [vmem:[#allocation5 + $0x104] sm:$0xf]  ;;  %v754_v27 = vld [vmem:[#allocation5 + $0x110] sm:$0xf0]  ;;  %v744_v28 = vld [vmem:[#allocation5 + $0xe8] sm:$0xf]  ;;  %v753_v36 = vor.u32 %v914_v22, %v752_v19  ;;  %v629_v37 = vor.u32 %v880_v23, %v626_v24 }
  0x25   :  { %512 = vmatpush.bf16.msra.mxu3 %v805_v62  ;;  %v911_v29 = vld [vmem:[#allocation5 + $0xf4] sm:$0xf0]  ;;  %v872_v30 = vld [vmem:[#allocation5 + $0x1e8] sm:$0xf]  ;;  %v909_v33 = vld [vmem:[#allocation5 + $0xec] sm:$0xf]  ;;  %v757_v41 = vor.u32 %v912_v26, %v754_v27 }
  0x26   :  { %471 = vmatpush.bf16.msra.mxu0 %v657_v4  ;;  %v943_v31 = vld [vmem:[#allocation5 + $0x1f4] sm:$0xf0]  ;;  %v746_v34 = vld [vmem:[#allocation5 + $0xf8] sm:$0xf0]  ;;  %v941_v35 = vld [vmem:[#allocation5 + $0x1ec] sm:$0xf]  ;;  %v745_v42 = vor.u32 %v911_v29, %v744_v28 }
  0x27   :  { %485 = vmatpush.bf16.msra.mxu1 %v785_v5  ;;  %v874_v38 = vld [vmem:[#allocation5 + $0x1f8] sm:$0xf0]  ;;  %v616_v39 = vld [vmem:[#allocation2] sm:$0xf]  ;;  %v879_v40 = vld [vmem:[#allocation2 + $0x4] sm:$0xf0]  ;;  %v873_v45 = vor.u32 %v943_v31, %v872_v30  ;;  %v749_v46 = vor.u32 %v909_v33, %v746_v34 }
  0x28   :  { %499 = vmatpush.bf16.msra.mxu2 %v661_v6  ;;  %v728_v43 = vld [vmem:[#allocation5 + $0xc8] sm:$0xf]  ;;  %v907_v44 = vld [vmem:[#allocation5 + $0xd4] sm:$0xf0]  ;;  %v878_v48 = vld [vmem:[#allocation2 + $0x4] sm:$0xf]  ;;  %v877_v50 = vor.u32 %v941_v35, %v874_v38  ;;  %v1094_v54 = vor.u32 %v879_v40, %v616_v39 }
  0x29   :  { %513 = vmatpush.bf16.msra.mxu3 %v789_v10  ;;  %v856_v47 = vld [vmem:[#allocation5 + $0x1c8] sm:$0xf]  ;;  %v618_v49 = vld [vmem:[#allocation2 + $0x8] sm:$0xf0]  ;;  %v939_v51 = vld [vmem:[#allocation5 + $0x1d4] sm:$0xf0]  ;;  %v729_v58 = vor.u32 %v907_v44, %v728_v43 }
  0x2a   :  { %472 = vmatpush.bf16.msra.mxu0 %v641_v16  ;;  %v905_v52 = vld [vmem:[#allocation5 + $0xcc] sm:$0xf]  ;;  %v730_v53 = vld [vmem:[#allocation5 + $0xd8] sm:$0xf0]  ;;  %v1096_v57 = vor.u32 %v878_v48, %v618_v49  ;;  %v857_v59 = vor.u32 %v939_v51, %v856_v47  ;;  %v712_v61 = vld [vmem:[#allocation5 + $0xa8] sm:$0xf] }
  0x2b   :  { %486 = vmatpush.bf16.msra.mxu1 %v769_v20  ;;  %v937_v55 = vld [vmem:[#allocation5 + $0x1cc] sm:$0xf]  ;;  %v858_v56 = vld [vmem:[#allocation5 + $0x1d8] sm:$0xf0]  ;;  %v733_v60 = vor.u32 %v905_v52, %v730_v53  ;;  %v903_v62 = vld [vmem:[#allocation5 + $0xb4] sm:$0xf0] }
  0x2c   :  { %500 = vmatpush.bf16.msra.mxu2 %v645_v21  ;;  %v840_v63 = vld [vmem:[#allocation5 + $0x1a8] sm:$0xf]  ;;  %v861_v0 = vor.u32 %v937_v55, %v858_v56  ;;  %v935_v1 = vld [vmem:[#allocation5 + $0x1b4] sm:$0xf0]  ;;  %v901_v2 = vld [vmem:[#allocation5 + $0xac] sm:$0xf]  ;;  %v713_v6 = vor.u32 %v903_v62, %v712_v61 }
  0x2d   :  { %514 = vmatpush.bf16.msra.mxu3 %v773_v25  ;;  %v714_v3 = vld [vmem:[#allocation5 + $0xb8] sm:$0xf0]  ;;  %v933_v4 = vld [vmem:[#allocation5 + $0x1ac] sm:$0xf]  ;;  %v841_v7 = vor.u32 %v935_v1, %v840_v63  ;;  %v696_v9 = vld [vmem:[#allocation5 + $0x88] sm:$0xf] }
  0x2e   :  { %473 = vmatpush.bf16.msra.mxu0 %v625_v32  ;;  %v842_v5 = vld [vmem:[#allocation5 + $0x1b8] sm:$0xf0]  ;;  %v717_v8 = vor.u32 %v901_v2, %v714_v3  ;;  %v899_v10 = vld [vmem:[#allocation5 + $0x94] sm:$0xf0]  ;;  %v824_v11 = vld [vmem:[#allocation5 + $0x188] sm:$0xf] }
  0x2f   :  { %487 = vmatpush.bf16.msra.mxu1 %v753_v36  ;;  %v845_v12 = vor.u32 %v933_v4, %v842_v5  ;;  %v931_v13 = vld [vmem:[#allocation5 + $0x194] sm:$0xf0]  ;;  %v897_v14 = vld [vmem:[#allocation5 + $0x8c] sm:$0xf]  ;;  %v698_v15 = vld [vmem:[#allocation5 + $0x98] sm:$0xf0]  ;;  %v697_v18 = vor.u32 %v899_v10, %v696_v9 }
  0x30   :  { %501 = vmatpush.bf16.msra.mxu2 %v629_v37  ;;  %v929_v16 = vld [vmem:[#allocation5 + $0x18c] sm:$0xf]  ;;  %v826_v17 = vld [vmem:[#allocation5 + $0x198] sm:$0xf0]  ;;  %v825_v19 = vor.u32 %v931_v13, %v824_v11  ;;  %v701_v20 = vor.u32 %v897_v14, %v698_v15  ;;  %v680_v21 = vld [vmem:[#allocation5 + $0x68] sm:$0xf] }
  0x31   :  { %515 = vmatpush.bf16.msra.mxu3 %v757_v41  ;;  %474 = vmatmul.bf16.vlgmr.msra.gmra.mxu0 %v1094_v54  ;;  %v895_v22 = vld [vmem:[#allocation5 + $0x74] sm:$0xf0]  ;;  %v808_v23 = vld [vmem:[#allocation5 + $0x168] sm:$0xf]  ;;  %v829_v24 = vor.u32 %v929_v16, %v826_v17  ;;  %v893_v26 = vld [vmem:[#allocation5 + $0x6c] sm:$0xf] }
  0x32   :  { %522 = vmatpush.bf16.msrb.mxu0 %v745_v42  ;;  %488 = vmatmul.bf16.vlgmr.msra.gmra.mxu1 %v1096_v57  ;;  %v927_v25 = vld [vmem:[#allocation5 + $0x174] sm:$0xf0]  ;;  %v682_v27 = vld [vmem:[#allocation5 + $0x78] sm:$0xf0]  ;;  %v925_v28 = vld [vmem:[#allocation5 + $0x16c] sm:$0xf]  ;;  %v681_v30 = vor.u32 %v895_v22, %v680_v21 }
  0x33   :  { %536 = vmatpush.bf16.msrb.mxu1 %v873_v45  ;;  %502 = vmatmul.bf16.vlgmr.msra.gmra.mxu2 %v1094_v54  ;;  %v810_v29 = vld [vmem:[#allocation5 + $0x178] sm:$0xf0]  ;;  %v809_v31 = vor.u32 %v927_v25, %v808_v23  ;;  %v685_v32 = vor.u32 %v893_v26, %v682_v27  ;;  %v664_v33 = vld [vmem:[#allocation5 + $0x48] sm:$0xf]  ;;  %v891_v34 = vld [vmem:[#allocation5 + $0x54] sm:$0xf0] }
  0x34   :  { %550 = vmatpush.bf16.msrb.mxu2 %v749_v46  ;;  %516 = vmatmul.bf16.vlgmr.msra.gmra.mxu3 %v1096_v57  ;;  %v792_v35 = vld [vmem:[#allocation5 + $0x148] sm:$0xf]  ;;  %v813_v36 = vor.u32 %v925_v28, %v810_v29  ;;  %v923_v37 = vld [vmem:[#allocation5 + $0x154] sm:$0xf0]  ;;  %v889_v38 = vld [vmem:[#allocation5 + $0x4c] sm:$0xf]  ;;  %v665_v42 = vor.u32 %v891_v34, %v664_v33 }
  0x35   :  { %564 = vmatpush.bf16.msrb.mxu3 %v877_v50  ;;  %v666_v39 = vld [vmem:[#allocation5 + $0x58] sm:$0xf0]  ;;  %v921_v40 = vld [vmem:[#allocation5 + $0x14c] sm:$0xf]  ;;  %v793_v43 = vor.u32 %v923_v37, %v792_v35  ;;  %v648_v45 = vld [vmem:[#allocation5 + $0x28] sm:$0xf] }
  0x36   :  { %523 = vmatpush.bf16.msrb.mxu0 %v729_v58  ;;  %v794_v41 = vld [vmem:[#allocation5 + $0x158] sm:$0xf0]  ;;  %v669_v44 = vor.u32 %v889_v38, %v666_v39  ;;  %v887_v46 = vld [vmem:[#allocation5 + $0x34] sm:$0xf0]  ;;  %v776_v47 = vld [vmem:[#allocation5 + $0x128] sm:$0xf] }
  0x37   :  { %537 = vmatpush.bf16.msrb.mxu1 %v857_v59  ;;  %v797_v48 = vor.u32 %v921_v40, %v794_v41  ;;  %v919_v49 = vld [vmem:[#allocation5 + $0x134] sm:$0xf0]  ;;  %v885_v50 = vld [vmem:[#allocation5 + $0x2c] sm:$0xf]  ;;  %v650_v51 = vld [vmem:[#allocation5 + $0x38] sm:$0xf0]  ;;  %v649_v55 = vor.u32 %v887_v46, %v648_v45 }
  0x38   :  { %551 = vmatpush.bf16.msrb.mxu2 %v733_v60  ;;  %v917_v52 = vld [vmem:[#allocation5 + $0x12c] sm:$0xf]  ;;  %v778_v53 = vld [vmem:[#allocation5 + $0x138] sm:$0xf0]  ;;  %v777_v56 = vor.u32 %v919_v49, %v776_v47  ;;  %v653_v58 = vor.u32 %v885_v50, %v650_v51  ;;  %v632_v59 = vld [vmem:[#allocation5 + $0x8] sm:$0xf] }
  0x39   :  { %565 = vmatpush.bf16.msrb.mxu3 %v861_v0  ;;  %v883_v60 = vld [vmem:[#allocation5 + $0x14] sm:$0xf0]  ;;  %v760_v61 = vld [vmem:[#allocation5 + $0x108] sm:$0xf]  ;;  %v781_v62 = vor.u32 %v917_v52, %v778_v53  ;;  %v881_v0 = vld [vmem:[#allocation5 + $0xc] sm:$0xf] }
  0x3a   :  { %524 = vmatpush.bf16.msrb.mxu0 %v713_v6  ;;  %v915_v63 = vld [vmem:[#allocation5 + $0x114] sm:$0xf0]  ;;  %v634_v1 = vld [vmem:[#allocation5 + $0x18] sm:$0xf0]  ;;  %v913_v2 = vld [vmem:[#allocation5 + $0x10c] sm:$0xf]  ;;  %v633_v4 = vor.u32 %v883_v60, %v632_v59 }
  0x3b   :  { %538 = vmatpush.bf16.msrb.mxu1 %v841_v7  ;;  %v762_v3 = vld [vmem:[#allocation5 + $0x118] sm:$0xf0]  ;;  %v761_v5 = vor.u32 %v915_v63, %v760_v61  ;;  %v637_v6 = vor.u32 %v881_v0, %v634_v1  ;;  %s1061_s2 = smov [#allocation8]   ;;  %s600_s5 = sshll.u32 %s1115_s3, 4  ;;  %s601_s5 = int_to_ptr.hbm [resolvable:$true] %s600_s5 }
  0x3c   :  { %552 = vmatpush.bf16.msrb.mxu2 %v717_v8  ;;  %v765_v7 = vor.u32 %v913_v2, %v762_v3  ;;  %v126_v8 = vld [vmem:[#allocation7] sm:$0xf]  ;;  %s598_s29 = sshll.u32 %s1061_s2, 4  ;;  %s599_s29 = int_to_ptr.vmem [resolvable:$true] %s598_s29 }
  0x3d   :  { %566 = vmatpush.bf16.msrb.mxu3 %v845_v12  ;;  %v128_v9 = vperm.slane %v126_v8, 0  ;;  %v129_v13 = vperm.slane %v126_v8, 1  ;;  %v131_v34 = vperm.slane %v126_v8, 3 }
  0x3e   :  { %525 = vmatpush.bf16.msrb.mxu0 %v697_v18 }
  0x3f   :  { %539 = vmatpush.bf16.msrb.mxu1 %v825_v19 }
  0x40   :  { %553 = vmatpush.bf16.msrb.mxu2 %v701_v20 }
  0x41   :  { %567 = vmatpush.bf16.msrb.mxu3 %v829_v24 }
  0x42   :  { %526 = vmatpush.bf16.msrb.mxu0 %v681_v30 }
  0x43   :  { %540 = vmatpush.bf16.msrb.mxu1 %v809_v31  ;;  %v130_v31 = vperm.slane %v126_v8, 2 }
  0x44   :  { %554 = vmatpush.bf16.msrb.mxu2 %v685_v32 }
  0x45   :  { %568 = vmatpush.bf16.msrb.mxu3 %v813_v36 }
  0x46   :  { %527 = vmatpush.bf16.msrb.mxu0 %v665_v42 }
  0x47   :  { %541 = vmatpush.bf16.msrb.mxu1 %v793_v43 }
  0x48   :  { %555 = vmatpush.bf16.msrb.mxu2 %v669_v44 }
  0x49   :  { %569 = vmatpush.bf16.msrb.mxu3 %v797_v48 }
  0x4a   :  { %528 = vmatpush.bf16.msrb.mxu0 %v649_v55 }
  0x4b   :  { %542 = vmatpush.bf16.msrb.mxu1 %v777_v56 }
  0x4c   :  { %556 = vmatpush.bf16.msrb.mxu2 %v653_v58 }
  0x4d   :  { %570 = vmatpush.bf16.msrb.mxu3 %v781_v62 }
  0x4e   :  { %529 = vmatpush.bf16.msrb.mxu0 %v633_v4 }
  0x4f   :  { %543 = vmatpush.bf16.msrb.mxu1 %v761_v5 }
  0x50   :  { %557 = vmatpush.bf16.msrb.mxu2 %v637_v6 }
  0x51   :  { %571 = vmatpush.bf16.msrb.mxu3 %v765_v7  ;;  %530 = vmatmul.bf16.vlgmr.msrb.gmra.mxu0 %v1094_v54 }
  0x52   :  { %544 = vmatmul.bf16.vlgmr.msrb.gmra.mxu1 %v1096_v57 }
  0x53   :  { %558 = vmatmul.bf16.vlgmr.msrb.gmra.mxu2 %v1094_v54 }
  0x54   :  { %572 = vmatmul.bf16.vlgmr.msrb.gmra.mxu3 %v1096_v57 }
  0xae   :  { %v475_v10 = vpop.f32.mrf.mxu0 }
  0xaf   :  { %v476_v11 = vadd.f32 %v475_v10, %v128_v9  ;;  %v489_v12 = vpop.f32.mrf.mxu1 }
  0xb1   :  { %v490_v14 = vadd.f32 %v489_v12, %v476_v11 }
  0xb3   :  { %v578_v18 = vmax.f32 %v490_v14, 0.0 }
  0xb6   :  { %v503_v15 = vpop.f32.mrf.mxu2  ;;  %v477_v20 = vpop.f32.mrf.mxu0 }
  0xb7   :  { %v504_v16 = vadd.f32 %v503_v15, %v129_v13  ;;  %v517_v17 = vpop.f32.mrf.mxu3  ;;  %v478_v21 = vadd.f32 %v477_v20, %v128_v9  ;;  %v491_v22 = vpop.f32.mrf.mxu1 }
  0xb9   :  { %v518_v19 = vadd.f32 %v517_v17, %v504_v16  ;;  %v492_v54 = vadd.f32 %v491_v22, %v478_v21 }
  0xbb   :  { %v579_v23 = vmax.f32 %v518_v19, 0.0  ;;  %v582_v27 = vmax.f32 %v492_v54, 0.0 }
  0xbd   :  { %v586_v24 = vpack.c.bf16 %v579_v23, %v578_v18 }
  0xbe   :  { %v505_v25 = vpop.f32.mrf.mxu2 }
  0xbf   :  { %590 = vst [vmem:[#allocation8] sm:$0xff] %v586_v24  ;;  %v506_v57 = vadd.f32 %v505_v25, %v129_v13  ;;  %v519_v26 = vpop.f32.mrf.mxu3 }
  0xc1   :  { %v520_v28 = vadd.f32 %v519_v26, %v506_v57 }
  0xc3   :  { %v583_v29 = vmax.f32 %v520_v28, 0.0 }
  0xc5   :  { %v588_v30 = vpack.c.bf16 %v583_v29, %v582_v27 }
  0xc7   :  { %592 = vst [vmem:[#allocation8 + $0x10] sm:$0xff] %v588_v30 }
  0xce   :  { %v531_v32 = vpop.f32.mrf.mxu0 }
  0xcf   :  { %v532_v33 = vadd.f32 %v531_v32, %v130_v31  ;;  %v545_v35 = vpop.f32.mrf.mxu1 }
  0xd1   :  { %v546_v36 = vadd.f32 %v545_v35, %v532_v33 }
  0xd3   :  { %v580_v41 = vmax.f32 %v546_v36, 0.0 }
  0xd6   :  { %v559_v37 = vpop.f32.mrf.mxu2  ;;  %v533_v40 = vpop.f32.mrf.mxu0 }
  0xd7   :  { %v560_v38 = vadd.f32 %v559_v37, %v131_v34  ;;  %v573_v39 = vpop.f32.mrf.mxu3  ;;  %v534_v44 = vadd.f32 %v533_v40, %v130_v31  ;;  %v547_v46 = vpop.f32.mrf.mxu1 }
  0xd9   :  { %v574_v42 = vadd.f32 %v573_v39, %v560_v38  ;;  %v548_v48 = vadd.f32 %v547_v46, %v534_v44 }
  0xdb   :  { %v581_v43 = vmax.f32 %v574_v42, 0.0  ;;  %v584_v52 = vmax.f32 %v548_v48, 0.0 }
  0xdd   :  { %v587_v45 = vpack.c.bf16 %v581_v43, %v580_v41 }
  0xde   :  { %v561_v47 = vpop.f32.mrf.mxu2 }
  0xdf   :  { %591 = vst [vmem:[#allocation8 + $0x8] sm:$0xff] %v587_v45  ;;  %v562_v49 = vadd.f32 %v561_v47, %v131_v34  ;;  %v575_v50 = vpop.f32.mrf.mxu3 }
  0xe1   :  { %v576_v51 = vadd.f32 %v575_v50, %v562_v49 }
  0xe3   :  { %v585_v53 = vmax.f32 %v576_v51, 0.0 }
  0xe5   :  { %v589_v55 = vpack.c.bf16 %v585_v53, %v584_v52 }
  0xe7   :  { %593 = vst [vmem:[#allocation8 + $0x18] sm:$0xff] %v589_v55 }
  0xe8   :  { %606 = dma.vmem_to_hbm [thread:$0]  %s599_s29, 512, %s601_s5, [#allocation4], %s1055_s20, %s1055_s20, %s1056_s21  }
  0xe9   :  { %1052 = dma.done.wait [#allocation4], 512  }
  0xea   :  { %1053 = vsyncadd [#allocation4], 4294966784 }
  0xeb   :  { %611 = vsyncpa [#allocation3], 1 }
  0xec   :  { %612 = vsyncpa [#allocation6], 1 }
  0xed   :  { %613 = vsyncpa [#allocation4], 1 }

</bundles_post_ra>
